<compile_context>
chip_gen: v6e
topology: v6e:2x2x1
jax: 0.10.0
libtpu: 0.0.40
codegen_flags: <defaults>
</compile_context>

<pallas_src>
import functools

import numpy as np
import jax
import jax.numpy as jnp
from jax import lax
from jax.experimental import pallas as pl
from jax.experimental.pallas import tpu as pltpu

GROUPS = 3
EPS = 1e-5


# --------------------------------------------------------------------------
# Pallas kernel: single step, whole batch fused into one (C, N*HW) slab.
# --------------------------------------------------------------------------
def shufflenet_unit_a_kernel(x_ref, w1_ref, b2_ref, wdp_ref, b4_ref,
                             w5_ref, b6_ref, o_ref, *, n_batch, height, width):
    hw = height * width
    nhw = n_batch * hw

    # Concatenate per-batch (C, HW) slabs along the lane axis -> (C, N*HW).
    # In-VMEM lane copy; keeps the HBM layout untouched.
    xw = jnp.concatenate([x_ref[n] for n in range(n_batch)], axis=1)   # bf16

    # ---- 1x1 group conv1 (dense block-diag, BN2 scale folded) + shift + ReLU
    t = jnp.dot(w1_ref[...], xw, preferred_element_type=jnp.float32)   # (Cbp, NHW) f32
    t = jnp.maximum(t + b2_ref[...], 0.0)

    # ---- depthwise 3x3 "same" conv: 8 lane rolls (XLU) + masked tap planes -
    # planes[k] = tap_weight[c, k] * border_mask_k(p), precomputed host-side.
    planes = wdp_ref[...]                                 # (9, Cbp, NHW) f32
    acc = t * planes[4]                                   # center tap (never masked)
    for dy in range(3):
        for dx in range(3):
            k = dy * 3 + dx
            if k == 4:
                continue
            off = (dy - 1) * width + (dx - 1)
            # src[p] = t[p + off]; any cross-image / wraparound pull lands on a
            # destination pixel whose folded mask is exactly 0.
            src = pltpu.roll(t, shift=(-off) % nhw, axis=1)
            acc = acc + src * planes[k]
    u = acc + b4_ref[...]                                 # BN4 shift (+ folded conv bias)

    # ---- 1x1 group conv5 (dense block-diag, BN6 folded) + residual + ReLU --
    y = jnp.dot(w5_ref[...], u.astype(w5_ref.dtype),
                preferred_element_type=jnp.float32)       # (C, NHW) f32
    y = jnp.maximum(xw.astype(jnp.float32) + y + b6_ref[...], 0.0)

    # split the wide slab back into lane-dense per-batch stores
    for n in range(n_batch):
        o_ref[n] = y[:, n * hw:(n + 1) * hw].astype(o_ref.dtype)


# --------------------------------------------------------------------------
# Wrapper: free reshape to (N, C, H*W) + bf16 cast; single-step pallas_call.
# --------------------------------------------------------------------------
def shufflenet_unit_a(x_nchw, folded):
    N, C, H, W = x_nchw.shape
    HW = H * W
    Cbp = folded['w1'].shape[0]
    assert folded['wdp'].shape == (9, Cbp, N * HW), \
        "fold_params was built for a different (N, H, W)"

    x2 = x_nchw.reshape(N, C, HW).astype(jnp.bfloat16)    # free reshape, halves DMA

    kernel = functools.partial(shufflenet_unit_a_kernel,
                               n_batch=N, height=H, width=W)
    grid_spec = pltpu.PrefetchScalarGridSpec(
        num_scalar_prefetch=0,
        grid=(1,),                                        # one step: no pipeline overhead
        in_specs=[
            pl.BlockSpec((N, C, HW), lambda i: (0, 0, 0)),        # x (bf16)
            pl.BlockSpec((Cbp, C), lambda i: (0, 0)),             # conv1 dense weight (bf16)
            pl.BlockSpec((Cbp, 1), lambda i: (0, 0)),             # bn2 shift
            pl.BlockSpec((9, Cbp, N * HW), lambda i: (0, 0, 0)),  # masked depthwise tap planes
            pl.BlockSpec((Cbp, 1), lambda i: (0, 0)),             # bn4 shift
            pl.BlockSpec((C, Cbp), lambda i: (0, 0)),             # conv5 dense weight (bf16)
            pl.BlockSpec((C, 1), lambda i: (0, 0)),               # bn6 shift
        ],
        out_specs=pl.BlockSpec((N, C, HW), lambda i: (0, 0, 0)),
    )
    out = pl.pallas_call(
        kernel,
        out_shape=jax.ShapeDtypeStruct((N, C, HW), jnp.float32),
        grid_spec=grid_spec,
        # Single grid step, so buffering of the constant weights is moot here;
        # at production sizes single-buffer them (pipeline_mode=pl.Buffered(1))
        # and re-budget VMEM for v7x (vmem_limit_bytes + H-tiling with halo).
        compiler_params=pltpu.CompilerParams(dimension_semantics=("arbitrary",)),
    )(x2, folded['w1'], folded['b2'], folded['wdp'], folded['b4'],
      folded['w5'], folded['b6'])
    return out.reshape(N, C, H, W)


# --------------------------------------------------------------------------
# Parameter construction + folding (host-side glue, runs once).
# --------------------------------------------------------------------------
def make_params(key, channels, groups=GROUPS):
    """Deterministic synthetic parameters with the same shapes as the PyTorch module."""
    Cb = channels // 4
    ks = jax.random.split(key, 18)

    def nrm(k, shape, scale=0.2):
        return scale * jax.random.normal(k, shape, jnp.float32)

    return dict(
        w1=nrm(ks[0], (Cb, channels // groups, 1, 1)), b1=nrm(ks[1], (Cb,)),
        g2=1.0 + 0.1 * jax.random.normal(ks[2], (Cb,)), be2=nrm(ks[3], (Cb,)),
        rm2=nrm(ks[4], (Cb,)), rv2=0.5 + jax.random.uniform(ks[5], (Cb,)),
        wd=nrm(ks[6], (Cb, 1, 3, 3)), bd=nrm(ks[7], (Cb,)),
        g4=1.0 + 0.1 * jax.random.normal(ks[8], (Cb,)), be4=nrm(ks[9], (Cb,)),
        rm4=nrm(ks[10], (Cb,)), rv4=0.5 + jax.random.uniform(ks[11], (Cb,)),
        w5=nrm(ks[12], (channels, Cb // groups, 1, 1)), b5=nrm(ks[13], (channels,)),
        g6=1.0 + 0.1 * jax.random.normal(ks[14], (channels,)), be6=nrm(ks[15], (channels,)),
        rm6=nrm(ks[16], (channels,)), rv6=0.5 + jax.random.uniform(ks[17], (channels,)),
    )


def fold_params(p, channels, height, width, n_batch, groups=GROUPS):
    """Fold group structure, channel shuffle, conv biases, eval-mode BN and the
    depthwise border masks into dense (sublane-padded) weights/planes."""
    Cb = channels // 4
    Cbp = ((Cb + 7) // 8) * 8                 # pad bottleneck channels to a sublane multiple
    cin_g, cb_g, cout_g = channels // groups, Cb // groups, channels // groups
    hw = height * width

    # dense block-diagonal weights, (in_channels, out_channels) layout
    W1 = np.zeros((channels, Cb), np.float32)
    w1 = np.asarray(p['w1'])
    for o in range(Cb):
        g = o // cb_g
        W1[g * cin_g:(g + 1) * cin_g, o] = w1[o, :, 0, 0]
    W5 = np.zeros((Cb, channels), np.float32)
    w5 = np.asarray(p['w5'])
    for o in range(channels):
        g = o // cout_g
        W5[g * cb_g:(g + 1) * cb_g, o] = w5[o, :, 0, 0]

    # inverse channel-shuffle permutation (shuffled[j] = orig[P[j]], pinv = P^-1)
    cpg = Cb // groups
    pinv = np.array([(c % cpg) * groups + c // cpg for c in range(Cb)], np.int32)

    # eval-mode BatchNorm folds: bn(z) = a*z + c
    a2 = np.asarray(p['g2']) / np.sqrt(np.asarray(p['rv2']) + EPS)
    c2 = np.asarray(p['be2']) - np.asarray(p['rm2']) * a2
    a4 = np.asarray(p['g4']) / np.sqrt(np.asarray(p['rv4']) + EPS)
    c4 = np.asarray(p['be4']) - np.asarray(p['rm4']) * a4
    a6 = np.asarray(p['g6']) / np.sqrt(np.asarray(p['rv6']) + EPS)
    c6 = np.asarray(p['be6']) - np.asarray(p['rm6']) * a6

    # conv1 + BN2: fold BN scale into the matrix, keep the shift separate
    W1f = (W1 * a2[None, :]).T                        # (Cb, C)
    b2 = (a2 * np.asarray(p['b1']) + c2)[:, None]     # (Cb, 1)

    # channel shuffle folded by permuting everything downstream of conv1
    wd = np.asarray(p['wd'])[pinv]                    # (Cb, 1, 3, 3)
    bd = np.asarray(p['bd'])[pinv]
    a4p, c4p = a4[pinv], c4[pinv]
    wdf = wd[:, 0].reshape(Cb, 9) * a4p[:, None]      # (Cb, 9), col index = dy*3+dx
    b4 = (a4p * bd + c4p)[:, None]                    # (Cb, 1)

    # conv5: permute input rows by the inverse shuffle, fold BN6 scale
    W5f = (W5[pinv, :] * a6[None, :]).T               # (C, Cb)
    b6 = (a6 * np.asarray(p['b5']) + c6)[:, None]     # (C, 1)

    # depthwise tap planes with border masks folded in, tiled across the batch
    # (padded bottleneck channels are all-zero so they stay zero end-to-end)
    hh, ww = np.divmod(np.arange(hw), width)
    planes = np.zeros((9, Cbp, n_batch * hw), np.float32)
    for dy in range(3):
        for dx in range(3):
            k = dy * 3 + dx
            mask = np.ones(hw, np.float32)
            if dy == 0:
                mask *= (hh >= 1)
            if dy == 2:
                mask *= (hh < height - 1)
            if dx == 0:
                mask *= (ww >= 1)
            if dx == 2:
                mask *= (ww < width - 1)
            planes[k, :Cb, :] = wdf[:, k:k + 1] * np.tile(mask, n_batch)[None, :]

    # sublane padding (Cb -> Cbp) with zeros
    W1f_p = np.zeros((Cbp, channels), np.float32); W1f_p[:Cb] = W1f
    b2_p = np.zeros((Cbp, 1), np.float32);         b2_p[:Cb] = b2
    b4_p = np.zeros((Cbp, 1), np.float32);         b4_p[:Cb] = b4
    W5f_p = np.zeros((channels, Cbp), np.float32); W5f_p[:, :Cb] = W5f

    return dict(
        w1=jnp.asarray(W1f_p, jnp.bfloat16),          # bf16 MXU operands
        b2=jnp.asarray(b2_p),
        wdp=jnp.asarray(planes),                      # f32 masked tap planes
        b4=jnp.asarray(b4_p),
        w5=jnp.asarray(W5f_p, jnp.bfloat16),
        b6=jnp.asarray(b6),
    )


# --------------------------------------------------------------------------
# Pure-JAX reference reproducing the PyTorch forward (eval-mode BN).
# --------------------------------------------------------------------------
def _bn_eval(x, g, b, rm, rv):
    a = g / jnp.sqrt(rv + EPS)
    return x * a[None, :, None, None] + (b - rm * a)[None, :, None, None]


def reference(x, p, groups=GROUPS):
    dn = ('NCHW', 'OIHW', 'NCHW')
    y = lax.conv_general_dilated(x, p['w1'], (1, 1), 'VALID',
                                 dimension_numbers=dn, feature_group_count=groups)
    y = y + p['b1'][None, :, None, None]
    y = jax.nn.relu(_bn_eval(y, p['g2'], p['be2'], p['rm2'], p['rv2']))
    N, C, H, W = y.shape
    y = y.reshape(N, groups, C // groups, H, W).transpose(0, 2, 1, 3, 4).reshape(N, C, H, W)
    y = lax.conv_general_dilated(y, p['wd'], (1, 1), ((1, 1), (1, 1)),
                                 dimension_numbers=dn, feature_group_count=C)
    y = y + p['bd'][None, :, None, None]
    y = _bn_eval(y, p['g4'], p['be4'], p['rm4'], p['rv4'])
    y = lax.conv_general_dilated(y, p['w5'], (1, 1), 'VALID',
                                 dimension_numbers=dn, feature_group_count=groups)
    y = y + p['b5'][None, :, None, None]
    y = _bn_eval(y, p['g6'], p['be6'], p['rm6'], p['rv6'])
    return jax.nn.relu(x + y)


if __name__ == "__main__":
    key = jax.random.PRNGKey(0)
    kx, kp = jax.random.split(key)
    # channels must be divisible by 4 (bottleneck) and by groups=3 at both levels
    N, C, H, W = 2, 24, 16, 16
    x = jax.random.normal(kx, (N, C, H, W), jnp.float32)

    params = make_params(kp, C)
    folded = fold_params(params, C, H, W, N)

    out = shufflenet_unit_a(x, folded)
    out = jax.block_until_ready(out)

    ref = reference(x, params)
    err = float(np.max(np.abs(np.asarray(out) - np.asarray(ref))))
    # tolerance loosened to 5e-2 because activations and matmul operands are bf16
    if not np.allclose(np.asarray(out), np.asarray(ref), atol=5e-2, rtol=5e-2):
        raise AssertionError(f"Pallas kernel mismatch vs reference, max abs err = {err}")
    print("KERNEL_OK")
</pallas_src>

<mosaic_0001>
module attributes {stable_mosaic.version = 11 : i64} {
  func.func @shufflenet_unit_a_kernel(%arg0: i32, %arg1: memref<2x24x256xbf16, #tpu.memory_space<vmem>>, %arg2: memref<8x24xbf16, #tpu.memory_space<vmem>>, %arg3: memref<8x1xf32, #tpu.memory_space<vmem>>, %arg4: memref<9x8x512xf32, #tpu.memory_space<vmem>>, %arg5: memref<8x1xf32, #tpu.memory_space<vmem>>, %arg6: memref<24x8xbf16, #tpu.memory_space<vmem>>, %arg7: memref<24x1xf32, #tpu.memory_space<vmem>>, %arg8: memref<2x24x256xf32, #tpu.memory_space<vmem>>) attributes {dimension_semantics = [#tpu.dimension_semantics<arbitrary>], iteration_bounds = array<i64: 1>, scalar_prefetch = 0 : i64, scratch_operands = 0 : i64, tpu.core_type = #tpu.core_type<tc>, window_params = [{pipeline_mode = #tpu.pipeline_mode<synchronous>, transform_indices = @transform_0, window_bounds = array<i64: 2, 24, 256>}, {pipeline_mode = #tpu.pipeline_mode<synchronous>, transform_indices = @transform_1, window_bounds = array<i64: 8, 24>}, {pipeline_mode = #tpu.pipeline_mode<synchronous>, transform_indices = @transform_2, window_bounds = array<i64: 8, 1>}, {pipeline_mode = #tpu.pipeline_mode<synchronous>, transform_indices = @transform_3, window_bounds = array<i64: 9, 8, 512>}, {pipeline_mode = #tpu.pipeline_mode<synchronous>, transform_indices = @transform_4, window_bounds = array<i64: 8, 1>}, {pipeline_mode = #tpu.pipeline_mode<synchronous>, transform_indices = @transform_5, window_bounds = array<i64: 24, 8>}, {pipeline_mode = #tpu.pipeline_mode<synchronous>, transform_indices = @transform_6, window_bounds = array<i64: 24, 1>}, {pipeline_mode = #tpu.pipeline_mode<synchronous>, transform_indices = @transform_7, window_bounds = array<i64: 2, 24, 256>}]} {
    %c0 = arith.constant 0 : index
    %c0_0 = arith.constant 0 : index
    %c0_1 = arith.constant 0 : index
    %0 = vector.load %arg1[%c0, %c0_0, %c0_1] : memref<2x24x256xbf16, #tpu.memory_space<vmem>>, vector<1x24x256xbf16>
    %1 = vector.shape_cast %0 : vector<1x24x256xbf16> to vector<24x256xbf16>
    %c1 = arith.constant 1 : index
    %c0_2 = arith.constant 0 : index
    %c0_3 = arith.constant 0 : index
    %2 = vector.load %arg1[%c1, %c0_2, %c0_3] : memref<2x24x256xbf16, #tpu.memory_space<vmem>>, vector<1x24x256xbf16>
    %3 = vector.shape_cast %2 : vector<1x24x256xbf16> to vector<24x256xbf16>
    %4 = tpu.concatenate %1, %3 in 1 : vector<24x256xbf16>, vector<24x256xbf16> -> vector<24x512xbf16>
    %c0_4 = arith.constant 0 : index
    %c0_5 = arith.constant 0 : index
    %5 = vector.load %arg2[%c0_4, %c0_5] : memref<8x24xbf16, #tpu.memory_space<vmem>>, vector<8x24xbf16>
    %cst = arith.constant dense<0.000000e+00> : vector<8x512xf32>
    %6 = tpu.matmul %5, %4, %cst {dimension_numbers = #tpu.dot_dimension_numbers<[1], [0], [0], [1], [0, 0, 1, 1], [], []>} : vector<8x24xbf16>, vector<24x512xbf16>, vector<8x512xf32> -> vector<8x512xf32>
    %c0_6 = arith.constant 0 : index
    %c0_7 = arith.constant 0 : index
    %7 = vector.load %arg3[%c0_6, %c0_7] : memref<8x1xf32, #tpu.memory_space<vmem>>, vector<8x1xf32>
    %8 = vector.broadcast %7 : vector<8x1xf32> to vector<8x512xf32>
    %9 = arith.addf %6, %8 : vector<8x512xf32>
    %cst_8 = arith.constant 0.000000e+00 : f32
    %10 = vector.broadcast %cst_8 : f32 to vector<8x512xf32>
    %11 = arith.maximumf %9, %10 : vector<8x512xf32>
    %c0_9 = arith.constant 0 : index
    %c0_10 = arith.constant 0 : index
    %c0_11 = arith.constant 0 : index
    %12 = vector.load %arg4[%c0_9, %c0_10, %c0_11] : memref<9x8x512xf32, #tpu.memory_space<vmem>>, vector<9x8x512xf32>
    %13 = vector.extract_strided_slice %12 {offsets = [4, 0, 0], sizes = [1, 8, 512], strides = [1, 1, 1]} : vector<9x8x512xf32> to vector<1x8x512xf32>
    %14 = vector.shape_cast %13 : vector<1x8x512xf32> to vector<8x512xf32>
    %15 = arith.mulf %11, %14 : vector<8x512xf32>
    %c17_i32 = arith.constant 17 : i32
    %16 = tpu.dynamic_rotate %11 by %c17_i32 dim 1 : vector<8x512xf32>, i32 -> vector<8x512xf32>
    %17 = vector.extract_strided_slice %12 {offsets = [0, 0, 0], sizes = [1, 8, 512], strides = [1, 1, 1]} : vector<9x8x512xf32> to vector<1x8x512xf32>
    %18 = vector.shape_cast %17 : vector<1x8x512xf32> to vector<8x512xf32>
    %19 = arith.mulf %16, %18 : vector<8x512xf32>
    %20 = arith.addf %15, %19 : vector<8x512xf32>
    %c16_i32 = arith.constant 16 : i32
    %21 = tpu.dynamic_rotate %11 by %c16_i32 dim 1 : vector<8x512xf32>, i32 -> vector<8x512xf32>
    %22 = vector.extract_strided_slice %12 {offsets = [1, 0, 0], sizes = [1, 8, 512], strides = [1, 1, 1]} : vector<9x8x512xf32> to vector<1x8x512xf32>
    %23 = vector.shape_cast %22 : vector<1x8x512xf32> to vector<8x512xf32>
    %24 = arith.mulf %21, %23 : vector<8x512xf32>
    %25 = arith.addf %20, %24 : vector<8x512xf32>
    %c15_i32 = arith.constant 15 : i32
    %26 = tpu.dynamic_rotate %11 by %c15_i32 dim 1 : vector<8x512xf32>, i32 -> vector<8x512xf32>
    %27 = vector.extract_strided_slice %12 {offsets = [2, 0, 0], sizes = [1, 8, 512], strides = [1, 1, 1]} : vector<9x8x512xf32> to vector<1x8x512xf32>
    %28 = vector.shape_cast %27 : vector<1x8x512xf32> to vector<8x512xf32>
    %29 = arith.mulf %26, %28 : vector<8x512xf32>
    %30 = arith.addf %25, %29 : vector<8x512xf32>
    %c1_i32 = arith.constant 1 : i32
    %31 = tpu.dynamic_rotate %11 by %c1_i32 dim 1 : vector<8x512xf32>, i32 -> vector<8x512xf32>
    %32 = vector.extract_strided_slice %12 {offsets = [3, 0, 0], sizes = [1, 8, 512], strides = [1, 1, 1]} : vector<9x8x512xf32> to vector<1x8x512xf32>
    %33 = vector.shape_cast %32 : vector<1x8x512xf32> to vector<8x512xf32>
    %34 = arith.mulf %31, %33 : vector<8x512xf32>
    %35 = arith.addf %30, %34 : vector<8x512xf32>
    %c511_i32 = arith.constant 511 : i32
    %36 = tpu.dynamic_rotate %11 by %c511_i32 dim 1 : vector<8x512xf32>, i32 -> vector<8x512xf32>
    %37 = vector.extract_strided_slice %12 {offsets = [5, 0, 0], sizes = [1, 8, 512], strides = [1, 1, 1]} : vector<9x8x512xf32> to vector<1x8x512xf32>
    %38 = vector.shape_cast %37 : vector<1x8x512xf32> to vector<8x512xf32>
    %39 = arith.mulf %36, %38 : vector<8x512xf32>
    %40 = arith.addf %35, %39 : vector<8x512xf32>
    %c497_i32 = arith.constant 497 : i32
    %41 = tpu.dynamic_rotate %11 by %c497_i32 dim 1 : vector<8x512xf32>, i32 -> vector<8x512xf32>
    %42 = vector.extract_strided_slice %12 {offsets = [6, 0, 0], sizes = [1, 8, 512], strides = [1, 1, 1]} : vector<9x8x512xf32> to vector<1x8x512xf32>
    %43 = vector.shape_cast %42 : vector<1x8x512xf32> to vector<8x512xf32>
    %44 = arith.mulf %41, %43 : vector<8x512xf32>
    %45 = arith.addf %40, %44 : vector<8x512xf32>
    %c496_i32 = arith.constant 496 : i32
    %46 = tpu.dynamic_rotate %11 by %c496_i32 dim 1 : vector<8x512xf32>, i32 -> vector<8x512xf32>
    %47 = vector.extract_strided_slice %12 {offsets = [7, 0, 0], sizes = [1, 8, 512], strides = [1, 1, 1]} : vector<9x8x512xf32> to vector<1x8x512xf32>
    %48 = vector.shape_cast %47 : vector<1x8x512xf32> to vector<8x512xf32>
    %49 = arith.mulf %46, %48 : vector<8x512xf32>
    %50 = arith.addf %45, %49 : vector<8x512xf32>
    %c495_i32 = arith.constant 495 : i32
    %51 = tpu.dynamic_rotate %11 by %c495_i32 dim 1 : vector<8x512xf32>, i32 -> vector<8x512xf32>
    %52 = vector.extract_strided_slice %12 {offsets = [8, 0, 0], sizes = [1, 8, 512], strides = [1, 1, 1]} : vector<9x8x512xf32> to vector<1x8x512xf32>
    %53 = vector.shape_cast %52 : vector<1x8x512xf32> to vector<8x512xf32>
    %54 = arith.mulf %51, %53 : vector<8x512xf32>
    %55 = arith.addf %50, %54 : vector<8x512xf32>
    %c0_12 = arith.constant 0 : index
    %c0_13 = arith.constant 0 : index
    %56 = vector.load %arg5[%c0_12, %c0_13] : memref<8x1xf32, #tpu.memory_space<vmem>>, vector<8x1xf32>
    %57 = vector.broadcast %56 : vector<8x1xf32> to vector<8x512xf32>
    %58 = arith.addf %55, %57 : vector<8x512xf32>
    %c0_14 = arith.constant 0 : index
    %c0_15 = arith.constant 0 : index
    %59 = vector.load %arg6[%c0_14, %c0_15] : memref<24x8xbf16, #tpu.memory_space<vmem>>, vector<24x8xbf16>
    %60 = arith.truncf %58 : vector<8x512xf32> to vector<8x512xbf16>
    %cst_16 = arith.constant dense<0.000000e+00> : vector<24x512xf32>
    %61 = tpu.matmul %59, %60, %cst_16 {dimension_numbers = #tpu.dot_dimension_numbers<[1], [0], [0], [1], [0, 0, 1, 1], [], []>} : vector<24x8xbf16>, vector<8x512xbf16>, vector<24x512xf32> -> vector<24x512xf32>
    %62 = arith.extf %4 : vector<24x512xbf16> to vector<24x512xf32>
    %63 = arith.addf %62, %61 : vector<24x512xf32>
    %c0_17 = arith.constant 0 : index
    %c0_18 = arith.constant 0 : index
    %64 = vector.load %arg7[%c0_17, %c0_18] : memref<24x1xf32, #tpu.memory_space<vmem>>, vector<24x1xf32>
    %65 = vector.broadcast %64 : vector<24x1xf32> to vector<24x512xf32>
    %66 = arith.addf %63, %65 : vector<24x512xf32>
    %cst_19 = arith.constant 0.000000e+00 : f32
    %67 = vector.broadcast %cst_19 : f32 to vector<24x512xf32>
    %68 = arith.maximumf %66, %67 : vector<24x512xf32>
    %69 = vector.extract_strided_slice %68 {offsets = [0, 0], sizes = [24, 256], strides = [1, 1]} : vector<24x512xf32> to vector<24x256xf32>
    %c0_20 = arith.constant 0 : index
    %c0_21 = arith.constant 0 : index
    %c0_22 = arith.constant 0 : index
    %70 = vector.load %arg8[%c0_20, %c0_21, %c0_22] : memref<2x24x256xf32, #tpu.memory_space<vmem>>, vector<1x24x256xf32>
    %71 = vector.shape_cast %70 : vector<1x24x256xf32> to vector<24x256xf32>
    %72 = vector.shape_cast %69 : vector<24x256xf32> to vector<1x24x256xf32>
    tpu.vector_store %arg8[%c0_20, %c0_21, %c0_22], %72 {strides = array<i32>} : memref<2x24x256xf32, #tpu.memory_space<vmem>>, vector<1x24x256xf32>,
    %73 = vector.extract_strided_slice %68 {offsets = [0, 256], sizes = [24, 256], strides = [1, 1]} : vector<24x512xf32> to vector<24x256xf32>
    %c1_23 = arith.constant 1 : index
    %c0_24 = arith.constant 0 : index
    %c0_25 = arith.constant 0 : index
    %74 = vector.load %arg8[%c1_23, %c0_24, %c0_25] : memref<2x24x256xf32, #tpu.memory_space<vmem>>, vector<1x24x256xf32>
    %75 = vector.shape_cast %74 : vector<1x24x256xf32> to vector<24x256xf32>
    %76 = vector.shape_cast %73 : vector<24x256xf32> to vector<1x24x256xf32>
    tpu.vector_store %arg8[%c1_23, %c0_24, %c0_25], %76 {strides = array<i32>} : memref<2x24x256xf32, #tpu.memory_space<vmem>>, vector<1x24x256xf32>,
    return
  }
  func.func @transform_0(%arg0: i32) -> (i32, i32, i32) {
    %c0_i32 = arith.constant 0 : i32
    %c0_i32_0 = arith.constant 0 : i32
    %c0_i32_1 = arith.constant 0 : i32
    %c0_i32_2 = arith.constant 0 : i32
    return %c0_i32, %c0_i32_0, %c0_i32_1 : i32, i32, i32
  }
  func.func @transform_1(%arg0: i32) -> (i32, i32) {
    %c0_i32 = arith.constant 0 : i32
    %c0_i32_0 = arith.constant 0 : i32
    %c0_i32_1 = arith.constant 0 : i32
    return %c0_i32, %c0_i32_0 : i32, i32
  }
  func.func @transform_2(%arg0: i32) -> (i32, i32) {
    %c0_i32 = arith.constant 0 : i32
    %c0_i32_0 = arith.constant 0 : i32
    %c0_i32_1 = arith.constant 0 : i32
    return %c0_i32, %c0_i32_0 : i32, i32
  }
  func.func @transform_3(%arg0: i32) -> (i32, i32, i32) {
    %c0_i32 = arith.constant 0 : i32
    %c0_i32_0 = arith.constant 0 : i32
    %c0_i32_1 = arith.constant 0 : i32
    %c0_i32_2 = arith.constant 0 : i32
    return %c0_i32, %c0_i32_0, %c0_i32_1 : i32, i32, i32
  }
  func.func @transform_4(%arg0: i32) -> (i32, i32) {
    %c0_i32 = arith.constant 0 : i32
    %c0_i32_0 = arith.constant 0 : i32
    %c0_i32_1 = arith.constant 0 : i32
    return %c0_i32, %c0_i32_0 : i32, i32
  }
  func.func @transform_5(%arg0: i32) -> (i32, i32) {
    %c0_i32 = arith.constant 0 : i32
    %c0_i32_0 = arith.constant 0 : i32
    %c0_i32_1 = arith.constant 0 : i32
    return %c0_i32, %c0_i32_0 : i32, i32
  }
  func.func @transform_6(%arg0: i32) -> (i32, i32) {
    %c0_i32 = arith.constant 0 : i32
    %c0_i32_0 = arith.constant 0 : i32
    %c0_i32_1 = arith.constant 0 : i32
    return %c0_i32, %c0_i32_0 : i32, i32
  }
  func.func @transform_7(%arg0: i32) -> (i32, i32, i32) {
    %c0_i32 = arith.constant 0 : i32
    %c0_i32_0 = arith.constant 0 : i32
    %c0_i32_1 = arith.constant 0 : i32
    %c0_i32_2 = arith.constant 0 : i32
    return %c0_i32, %c0_i32_0, %c0_i32_1 : i32, i32, i32
  }
}

</mosaic_0001>

<bundles_post_ra>
// kernel: tpu_custom_call.1
= control target key start
LH: loop header
LB: loop body
LE: loop exit
PB: predicated region body
PF: predicated region fallthrough
CT: control target
= control target key end

     0   :  { %12 = vsyncpa [#allocation3], 0  ;;  %s1101_s0 = inlined_call_operand.vmem [shape: bf16[2,24,256], index: 0, kind: input, shape index: {}]   ;;  %s1102_s1 = inlined_call_operand.vmem [shape: bf16[8,24], index: 1, kind: input, shape index: {}]   ;;  %s1103_s2 = inlined_call_operand.vmem [shape: f32[8,1], index: 2, kind: input, shape index: {}]   ;;  %s1104_s3 = inlined_call_operand.hbm [shape: f32[9,8,512], index: 3, kind: input, shape index: {}]   ;;  %s1105_s4 = inlined_call_operand.vmem [shape: f32[8,1], index: 4, kind: input, shape index: {}]   ;;  %s1106_s5 = inlined_call_operand.vmem [shape: bf16[24,8], index: 5, kind: input, shape index: {}]   ;;  %s1107_s6 = inlined_call_operand.vmem [shape: f32[24,1], index: 6, kind: input, shape index: {}]   ;;  %s1108_s7 = inlined_call_operand.hbm [shape: f32[2,24,256], index: 7, kind: output, shape index: {}]  }
   0x1   :  { %13 = vsyncpa [#allocation4], 0  ;;  %s740_s24 = smov [#allocation2]  }
   0x2   :  { %s25_s25 = sshll.u32 %s740_s24, 4  ;;  %s26_s25 = int_to_ptr.vmem [resolvable:$true] %s25_s25 }
   0x3   :  { %s704_s26 = scalar_lea.vmem %s26_s25, 4608  ;;  %p709_p1 = scmp.lt.s32.totalorder %s26_s25, %s26_s25 }
   0x4   :  { %p705_p0 = scmp.ne.s32.totalorder %s26_s25, %s704_s26  ;;  %p710_p2 = scmp.lt.s32.totalorder %s704_s26, %s704_s26 }
   0x6   :  { %p711_p3 = por %p710_p2, %p709_p1 }
   0x8   :  { %p712_p4 = pnand %p711_p3, %p705_p0 }
   0xa   :  { %715 = shalt.err (!%p712_p4)
}
   0xb   :  { %s741_s27 = smov 512   ;;  %s742_s28 = smov 32  }
   0xc   :  { %31 = dma.hbm_to_vmem [thread:$0]  %s1104_s3, 4608, %s26_s25, [#allocation3], %s741_s27, %s741_s27, %s742_s28  }
   0xd   :  { %736 = dma.done.wait [#allocation3], 4608  }
   0xe   :  { %737 = vsyncadd [#allocation3], 4294962688  ;;  %v743_v0 = vmov 0   ;;  %v44_v1 = vld [vmem:[%s1101_s0 + $0x10] sm:$0xff]  ;;  %vm94_vm0 = vcmask 1043456   ;;  %v647_v2 = vld [vmem:[%s1101_s0 + $0x28] sm:$0xff]  ;;  %v241_v52 = vlaneseq }
   0xf   :  { %139 = vmatprep.mubr.bf16.mxu0 %v743_v0  ;;  %180 = vmatprep.mubr.bf16.mxu1 %v743_v0  ;;  %v807_v3 = vcombine.high %v44_v1, %v44_v1  ;;  %v809_v4 = vcombine.high %v647_v2, %v647_v2  ;;  %v811_v5 = vcombine.low %v44_v1, %v44_v1  ;;  %v818_v7 = vld [vmem:[%s1101_s0 + $0x4] ss:$8 sps:$4 sm:$0xff]   ;;  %v836_v11 = vld [vmem:[%s1101_s0] ss:$8 sps:$4 sm:$0xff]   ;;  %vm90_vm1 = vcmask 195584   ;;  %s747_s23 = smov 1  }
  0x10   :  { %682 = vset.pattern.permute.xlu0 %v743_v0  ;;  %683 = vset.pattern.permute.xlu1 %v743_v0  ;;  %v813_v6 = vcombine.low %v647_v2, %v647_v2  ;;  %v823_v8 = vld [vmem:[%s1101_s0 + $0x1c] ss:$8 sps:$4 sm:$0xff]   ;;  %v841_v12 = vld [vmem:[%s1101_s0 + $0x18] ss:$8 sps:$4 sm:$0xff]   ;;  %s744_s0 = smov 17   ;;  %s748_s24 = smov 127  }
  0x11   :  { %656 = vmatprep.subr.msk.bf16.mxu0 %vm94_vm0, %v807_v3  ;;  %658 = vmatprep.subr.msk.bf16.mxu1 %vm94_vm0, %v809_v4  ;;  %v96_v9 = vsel %vm94_vm0, %v811_v5, 0  ;;  %v84_v13 = vld [vmem:[%s1103_s2] sm:$0xff]  ;;  %s746_s2 = smov 15   ;;  %s749_s25 = smov 113   ;;  %v574_v34 = vld [vmem:[%s1107_s6 + $0x8] sm:$0xff]  ;;  %v575_v35 = vld [vmem:[%s1107_s6 + $0x10] sm:$0xff] }
  0x12   :  { %v102_v10 = vsel %vm94_vm0, %v813_v6, 0  ;;  %120 = vmatpush1.bf16.msra.mxu0 %v96_v9  ;;  %87 = vperm.xlu0 %682, %v84_v13   ;;  %v83_v14 = vld [vmem:[%s1102_s1] sm:$0xf]  ;;  %s745_s1 = smov 16   ;;  %s750_s26 = smov 112   ;;  %v937_v55 = vand.u32 127, %v241_v52 }
  0x13   :  { %161 = vmatpush1.bf16.msra.mxu1 %v102_v10  ;;  %121 = vmatprep.subr.bf16.mxu0 %v818_v7  ;;  %s751_s27 = smov 111   ;;  %v403_v32 = vld [vmem:[%s1105_s4] sm:$0xff]  ;;  %v196_v62 = vld [vmem:[#allocation2 + $0x18] sm:$0xff]  ;;  %v211_v2 = vld [vmem:[#allocation2 + $0x90] sm:$0xff]  ;;  %vm428_vm10 = vcmask 64512  }
  0x14   :  { %162 = vmatprep.subr.bf16.mxu1 %v823_v8  ;;  %v573_v33 = vld [vmem:[%s1107_s6] sm:$0xff]  ;;  %vm243_vm2 = vcmp.lt.s32.totalorder %v937_v55, 17  ;;  %v212_v9 = vld [vmem:[#allocation2 + $0x98] sm:$0xff]  ;;  %vm264_vm3 = vcmp.lt.s32.totalorder %v937_v55, 16  ;;  %v210_v13 = vld [vmem:[#allocation2 + $0x88] sm:$0xff]  ;;  %vm285_vm4 = vcmp.lt.s32.totalorder %v937_v55, 15 }
  0x15   :  { %v193_v58 = vld [vmem:[#allocation2] sm:$0xff]  ;;  %vm306_vm5 = vcmp.lt.s32.totalorder %v937_v55, 1  ;;  %vm327_vm6 = vcmp.lt.s32.totalorder %v937_v55, 127  ;;  %vm348_vm7 = vcmp.lt.s32.totalorder %v937_v55, 113  ;;  %vm369_vm8 = vcmp.lt.s32.totalorder %v937_v55, 112 }
  0x16   :  { %122 = vmatpush1.bf16.msra.mxu0 %v836_v11  ;;  %v209_v63 = vld [vmem:[#allocation2 + $0x80] sm:$0xff]  ;;  %vm390_vm9 = vcmp.lt.s32.totalorder %v937_v55, 111 }
  0x17   :  { %163 = vmatpush1.bf16.msra.mxu1 %v841_v12 }
  0x19   :  { %657 = vmatmul.mubr.msk.bf16.vlgmr.msra.gmra.mxu0 %vm90_vm1, %v83_v14 }
  0x1a   :  { %659 = vmatmul.mubr.msk.bf16.vlgmr.msra.gmra.mxu1 %vm90_vm1, %v83_v14  ;;  %479 = vmatprep.mubr.bf16.mxu0 %v743_v0  ;;  %v197_v14 = vld [vmem:[#allocation2 + $0x20] sm:$0xff] }
  0x1b   :  { %530 = vmatprep.mubr.bf16.mxu1 %v743_v0 }
  0x8d   :  { %v88_v15 = vpop.permute.xlu0 %87 }
  0xd9   :  { %v141_v16 = vpop.f32.mrf.mxu0 }
  0xda   :  { %v182_v17 = vpop.f32.mrf.mxu1  ;;  %v142_v18 = vadd.f32 %v141_v16, %v88_v15 }
  0xdb   :  { %v183_v19 = vadd.f32 %v182_v17, %v88_v15  ;;  %v143_v20 = vpop.f32.mrf.mxu0 }
  0xdc   :  { %v184_v21 = vpop.f32.mrf.mxu1  ;;  %v855_v22 = vmax.f32 %v142_v18, 0.0  ;;  %v144_v29 = vadd.f32 %v143_v20, %v88_v15  ;;  %v200_v20 = vld [vmem:[#allocation2 + $0x38] sm:$0xff] }
  0xdd   :  { %v857_v23 = vmax.f32 %v183_v19, 0.0  ;;  %v185_v24 = vadd.f32 %v184_v21, %v88_v15  ;;  %v145_v25 = vpop.f32.mrf.mxu0 }
  0xde   :  { %v186_v26 = vpop.f32.mrf.mxu1  ;;  %233 = vrot.lane.b32.xlu0 %v855_v22, %s744_s0  ;;  %v869_v31 = vmax.f32 %v144_v29, 0.0  ;;  %v229_v18 = vmul.f32 %v209_v63, %v855_v22 }
  0xdf   :  { %237 = vrot.lane.b32.xlu1 %v857_v23, %s744_s0  ;;  %v146_v27 = vpop.f32.mrf.mxu0  ;;  %v863_v30 = vmax.f32 %v185_v24, 0.0  ;;  %v231_v24 = vmul.f32 %v211_v2, %v857_v23 }
  0xe0   :  { %v187_v28 = vpop.f32.mrf.mxu1  ;;  %v230_v26 = vmul.f32 %v210_v13, %v869_v31 }
  0xe1   :  { %v232_v25 = vmul.f32 %v212_v9, %v863_v30  ;;  %v198_v28 = vld [vmem:[#allocation2 + $0x28] sm:$0xff] }
  0xe2   :  { %239 = vrot.lane.b32.xlu0 %v863_v30, %s744_s0 }
  0xe3   :  { %256 = vrot.lane.b32.xlu1 %v855_v22, %s745_s1 }
  0xe6   :  { %258 = vrot.lane.b32.xlu0 %v869_v31, %s745_s1 }
  0xe7   :  { %260 = vrot.lane.b32.xlu1 %v857_v23, %s745_s1 }
  0xea   :  { %262 = vrot.lane.b32.xlu0 %v863_v30, %s745_s1 }
  0xeb   :  { %277 = vrot.lane.b32.xlu1 %v855_v22, %s746_s2 }
  0xee   :  { %279 = vrot.lane.b32.xlu0 %v869_v31, %s746_s2 }
  0xef   :  { %281 = vrot.lane.b32.xlu1 %v857_v23, %s746_s2 }
  0xf2   :  { %283 = vrot.lane.b32.xlu0 %v863_v30, %s746_s2 }
  0xf3   :  { %298 = vrot.lane.b32.xlu1 %v855_v22, %s747_s23 }
  0xf6   :  { %300 = vrot.lane.b32.xlu0 %v869_v31, %s747_s23 }
  0xf7   :  { %302 = vrot.lane.b32.xlu1 %v857_v23, %s747_s23 }
  0xfa   :  { %304 = vrot.lane.b32.xlu0 %v863_v30, %s747_s23 }
  0xfb   :  { %319 = vrot.lane.b32.xlu1 %v855_v22, %s748_s24 }
  0xfe   :  { %321 = vrot.lane.b32.xlu0 %v869_v31, %s748_s24 }
  0xff   :  { %323 = vrot.lane.b32.xlu1 %v857_v23, %s748_s24 }
 0x102   :  { %325 = vrot.lane.b32.xlu0 %v863_v30, %s748_s24 }
 0x103   :  { %340 = vrot.lane.b32.xlu1 %v855_v22, %s749_s25 }
 0x106   :  { %342 = vrot.lane.b32.xlu0 %v869_v31, %s749_s25 }
 0x107   :  { %344 = vrot.lane.b32.xlu1 %v857_v23, %s749_s25 }
 0x10a   :  { %346 = vrot.lane.b32.xlu0 %v863_v30, %s749_s25 }
 0x10b   :  { %361 = vrot.lane.b32.xlu1 %v855_v22, %s750_s26 }
 0x10e   :  { %363 = vrot.lane.b32.xlu0 %v869_v31, %s750_s26 }
 0x10f   :  { %235 = vrot.lane.b32.xlu1 %v869_v31, %s744_s0 }
 0x112   :  { %367 = vrot.lane.b32.xlu0 %v863_v30, %s750_s26 }
 0x113   :  { %365 = vrot.lane.b32.xlu1 %v857_v23, %s750_s26 }
 0x116   :  { %384 = vrot.lane.b32.xlu0 %v869_v31, %s751_s27 }
 0x117   :  { %382 = vrot.lane.b32.xlu1 %v855_v22, %s751_s27 }
 0x11a   :  { %388 = vrot.lane.b32.xlu0 %v863_v30, %s751_s27 }
 0x11b   :  { %386 = vrot.lane.b32.xlu1 %v857_v23, %s751_s27 }
 0x11e   :  { %578 = vperm.xlu0 %682, %v573_v33   ;;  %v195_v33 = vld [vmem:[#allocation2 + $0x10] sm:$0xff] }
 0x11f   :  { %406 = vperm.xlu1 %683, %v403_v32   ;;  %v194_v32 = vld [vmem:[#allocation2 + $0x8] sm:$0xff] }
 0x122   :  { %588 = vperm.xlu0 %682, %v575_v35   ;;  %v201_v35 = vld [vmem:[#allocation2 + $0x40] sm:$0xff] }
 0x123   :  { %583 = vperm.xlu1 %683, %v574_v34   ;;  %v199_v34 = vld [vmem:[#allocation2 + $0x30] sm:$0xff] }
 0x150   :  { %v917_v37 = vpop.permute.xlu0 %233 }
 0x151   :  { %v915_v36 = vpop.permute.xlu1 %237 }
 0x154   :  { %v240_v39 = vpop.permute.xlu0 %239 }
 0x155   :  { %v257_v38 = vpop.permute.xlu1 %256  ;;  %v247_v59 = vsel %vm243_vm2, %v240_v39, %v917_v37  ;;  %v244_v1 = vsel %vm243_vm2, %v915_v36, %v240_v39  ;;  %v204_v39 = vld [vmem:[#allocation2 + $0x58] sm:$0xff] }
 0x156   :  { %v248_v10 = vmul.f32 %v247_v59, %v193_v58  ;;  %v251_v19 = vmul.f32 %v244_v1, %v196_v62  ;;  %v202_v59 = vld [vmem:[#allocation2 + $0x48] sm:$0xff]  ;;  %v203_v1 = vld [vmem:[#allocation2 + $0x50] sm:$0xff] }
 0x158   :  { %v259_v41 = vpop.permute.xlu0 %258  ;;  %v252_v27 = vadd.f32 %v248_v10, %v229_v18  ;;  %v255_v58 = vadd.f32 %v251_v19, %v232_v25  ;;  %v206_v25 = vld [vmem:[#allocation2 + $0x68] sm:$0xff] }
 0x159   :  { %v261_v40 = vpop.permute.xlu1 %260  ;;  %v267_v22 = vsel %vm264_vm3, %v257_v38, %v259_v41 }
 0x15a   :  { %v266_v23 = vsel %vm264_vm3, %v259_v41, %v261_v40  ;;  %v270_v63 = vmul.f32 %v267_v22, %v198_v28  ;;  %v207_v28 = vld [vmem:[#allocation2 + $0x70] sm:$0xff] }
 0x15b   :  { %v271_v10 = vmul.f32 %v266_v23, %v199_v34 }
 0x15c   :  { %v263_v43 = vpop.permute.xlu0 %262 }
 0x15d   :  { %v278_v42 = vpop.permute.xlu1 %277  ;;  %v268_v15 = vsel %vm264_vm3, %v263_v43, %v257_v38  ;;  %v265_v21 = vsel %vm264_vm3, %v261_v40, %v263_v43 }
 0x15e   :  { %v269_v29 = vmul.f32 %v268_v15, %v197_v14  ;;  %v272_v30 = vmul.f32 %v265_v21, %v200_v20 }
 0x160   :  { %v921_v45 = vpop.permute.xlu0 %279  ;;  %v273_v13 = vadd.f32 %v269_v29, %v252_v27  ;;  %v276_v15 = vadd.f32 %v272_v30, %v255_v58  ;;  %v208_v27 = vld [vmem:[#allocation2 + $0x78] sm:$0xff]  ;;  %v214_v29 = vld [vmem:[#allocation2 + $0xa8] sm:$0xff]  ;;  %v215_v30 = vld [vmem:[#allocation2 + $0xb0] sm:$0xff] }
 0x161   :  { %v919_v44 = vpop.permute.xlu1 %281  ;;  %v288_v62 = vsel %vm285_vm4, %v278_v42, %v921_v45 }
 0x162   :  { %v291_v18 = vmul.f32 %v288_v62, %v202_v59  ;;  %v213_v62 = vld [vmem:[#allocation2 + $0xa0] sm:$0xff] }
 0x164   :  { %v284_v47 = vpop.permute.xlu0 %283 }
 0x165   :  { %v923_v46 = vpop.permute.xlu1 %298  ;;  %v286_v31 = vsel %vm285_vm4, %v919_v44, %v284_v47  ;;  %v289_v43 = vsel %vm285_vm4, %v284_v47, %v278_v42  ;;  %v287_v47 = vsel %vm285_vm4, %v921_v45, %v919_v44 }
 0x166   :  { %v290_v42 = vmul.f32 %v289_v43, %v201_v35  ;;  %v293_v14 = vmul.f32 %v286_v31, %v204_v39  ;;  %v292_v21 = vmul.f32 %v287_v47, %v203_v1 }
 0x168   :  { %v927_v49 = vpop.permute.xlu0 %300  ;;  %v294_v34 = vadd.f32 %v290_v42, %v273_v13  ;;  %v297_v23 = vadd.f32 %v293_v14, %v276_v15  ;;  %v219_v13 = vld [vmem:[#allocation2 + $0xd0] sm:$0xff]  ;;  %v220_v42 = vld [vmem:[#allocation2 + $0xd8] sm:$0xff] }
 0x169   :  { %v925_v48 = vpop.permute.xlu1 %302  ;;  %v309_v45 = vsel %vm306_vm5, %v923_v46, %v927_v49 }
 0x16a   :  { %v308_v44 = vsel %vm306_vm5, %v927_v49, %v925_v48  ;;  %v312_v35 = vmul.f32 %v309_v45, %v206_v25 }
 0x16c   :  { %v931_v51 = vpop.permute.xlu0 %304 }
 0x16d   :  { %v929_v50 = vpop.permute.xlu1 %319  ;;  %v310_v22 = vsel %vm306_vm5, %v931_v51, %v923_v46  ;;  %v313_v46 = vmul.f32 %v308_v44, %v207_v28 }
 0x170   :  { %v935_v54 = vpop.permute.xlu0 %321 }
 0x171   :  { %v933_v53 = vpop.permute.xlu1 %323  ;;  %v330_v58 = vsel %vm327_vm6, %v929_v50, %v935_v54 }
 0x174   :  { %v941_v57 = vpop.permute.xlu0 %325 }
 0x175   :  { %v939_v56 = vpop.permute.xlu1 %340 }
 0x178   :  { %v949_v61 = vpop.permute.xlu0 %342 }
 0x179   :  { %v947_v60 = vpop.permute.xlu1 %344 }
 0x17c   :  { %v959_v17 = vpop.permute.xlu0 %346 }
 0x17d   :  { %v957_v16 = vpop.permute.xlu1 %361 }
 0x180   :  { %v979_v52 = vpop.permute.xlu0 %363 }
 0x181   :  { %v236_v38 = vpop.permute.xlu1 %235 }
 0x182   :  { %v245_v40 = vsel %vm243_vm2, %v236_v38, %v915_v36  ;;  %v246_v41 = vsel %vm243_vm2, %v917_v37, %v236_v38 }
 0x183   :  { %v249_v2 = vmul.f32 %v246_v41, %v194_v32  ;;  %v250_v9 = vmul.f32 %v245_v40, %v195_v33  ;;  %v329_v32 = vsel %vm327_vm6, %v935_v54, %v933_v53  ;;  %v216_v40 = vld [vmem:[#allocation2 + $0xb8] sm:$0xff]  ;;  %v351_v54 = vsel %vm348_vm7, %v939_v56, %v949_v61 }
 0x184   :  { %v996_v37 = vpop.permute.xlu0 %367  ;;  %v333_v59 = vmul.f32 %v329_v32, %v214_v29 }
 0x185   :  { %v253_v36 = vadd.f32 %v249_v2, %v230_v26  ;;  %v254_v19 = vadd.f32 %v250_v9, %v231_v24  ;;  %v994_v20 = vpop.permute.xlu1 %365  ;;  %v307_v24 = vsel %vm306_vm5, %v925_v48, %v931_v51  ;;  %v205_v26 = vld [vmem:[#allocation2 + $0x60] sm:$0xff]  ;;  %v328_v48 = vsel %vm327_vm6, %v933_v53, %v941_v57  ;;  %v218_v9 = vld [vmem:[#allocation2 + $0xc8] sm:$0xff] }
 0x186   :  { %v311_v43 = vmul.f32 %v310_v22, %v205_v26  ;;  %v314_v38 = vmul.f32 %v307_v24, %v208_v27  ;;  %v331_v53 = vsel %vm327_vm6, %v941_v57, %v929_v50  ;;  %v334_v41 = vmul.f32 %v328_v48, %v215_v30  ;;  %v223_v26 = vld [vmem:[#allocation2 + $0xf0] sm:$0xff]  ;;  %v224_v27 = vld [vmem:[#allocation2 + $0xf8] sm:$0xff]  ;;  %v225_v30 = vld [vmem:[#allocation2 + $0x100] sm:$0xff] }
 0x187   :  { %v274_v33 = vadd.f32 %v270_v63, %v253_v36  ;;  %v275_v49 = vadd.f32 %v271_v10, %v254_v19  ;;  %v217_v63 = vld [vmem:[#allocation2 + $0xc0] sm:$0xff]  ;;  %v350_v10 = vsel %vm348_vm7, %v949_v61, %v947_v60  ;;  %v349_v50 = vsel %vm348_vm7, %v947_v60, %v959_v17  ;;  %v228_v48 = vld [vmem:[#allocation2 + $0x118] sm:$0xff] }
 0x188   :  { %v385_v31 = vpop.permute.xlu0 %384  ;;  %v352_v57 = vsel %vm348_vm7, %v959_v17, %v939_v56  ;;  %v318_v61 = vadd.f32 %v314_v38, %v297_v23  ;;  %v332_v36 = vmul.f32 %v330_v58, %v213_v62  ;;  %v335_v19 = vmul.f32 %v331_v53, %v216_v40  ;;  %v221_v60 = vld [vmem:[#allocation2 + $0xe0] sm:$0xff]  ;;  %v222_v17 = vld [vmem:[#allocation2 + $0xe8] sm:$0xff]  ;;  %v227_v58 = vld [vmem:[#allocation2 + $0x110] sm:$0xff] }
 0x189   :  { %v295_v51 = vadd.f32 %v291_v18, %v274_v33  ;;  %v296_v39 = vadd.f32 %v292_v21, %v275_v49  ;;  %v383_v2 = vpop.permute.xlu1 %382  ;;  %v315_v18 = vadd.f32 %v311_v43, %v294_v34  ;;  %v353_v21 = vmul.f32 %v351_v54, %v217_v63 }
 0x18a   :  { %v354_v25 = vmul.f32 %v350_v10, %v218_v9  ;;  %v355_v28 = vmul.f32 %v349_v50, %v219_v13  ;;  %v356_v44 = vmul.f32 %v352_v57, %v220_v42  ;;  %v372_v56 = vsel %vm369_vm8, %v957_v16, %v979_v52 }
 0x18b   :  { %v316_v1 = vadd.f32 %v312_v35, %v295_v51  ;;  %v317_v47 = vadd.f32 %v313_v46, %v296_v39  ;;  %v371_v24 = vsel %vm369_vm8, %v979_v52, %v994_v20  ;;  %v370_v22 = vsel %vm369_vm8, %v994_v20, %v996_v37 }
 0x18c   :  { %v389_v45 = vpop.permute.xlu0 %388  ;;  %v373_v29 = vsel %vm369_vm8, %v996_v37, %v957_v16  ;;  %v336_v34 = vadd.f32 %v332_v36, %v315_v18  ;;  %v339_v23 = vadd.f32 %v335_v19, %v318_v61  ;;  %v393_v52 = vsel %vm390_vm9, %v383_v2, %v385_v31  ;;  %v226_v16 = vld [vmem:[#allocation2 + $0x108] sm:$0xff] }
 0x18d   :  { %v337_v14 = vadd.f32 %v333_v59, %v316_v1  ;;  %v338_v15 = vadd.f32 %v334_v41, %v317_v47  ;;  %v387_v49 = vpop.permute.xlu1 %386  ;;  %v394_v35 = vsel %vm390_vm9, %v389_v45, %v383_v2  ;;  %v374_v46 = vmul.f32 %v372_v56, %v221_v60 }
 0x18e   :  { %v375_v20 = vmul.f32 %v371_v24, %v222_v17  ;;  %v376_v51 = vmul.f32 %v370_v22, %v223_v26  ;;  %v377_v39 = vmul.f32 %v373_v29, %v224_v27  ;;  %v357_v43 = vadd.f32 %v353_v21, %v336_v34  ;;  %v694_v21 = vld [vmem:[%s1106_s5] sm:$0xff]  }
 0x18f   :  { %v358_v32 = vadd.f32 %v354_v25, %v337_v14  ;;  %v359_v33 = vadd.f32 %v355_v28, %v338_v15  ;;  %v360_v38 = vadd.f32 %v356_v44, %v339_v23  ;;  %v392_v37 = vsel %vm390_vm9, %v385_v31, %v387_v49  ;;  %v695_v25 = vld [vmem:[%s1106_s5 + $0x8] ss:$0 sps:$4 sm:$0xff]   ;;  %s752_s5 = smov [#allocation5]  }
 0x190   :  { %v391_v59 = vsel %vm390_vm9, %v387_v49, %v389_v45  ;;  %v395_v53 = vmul.f32 %v393_v52, %v225_v30  ;;  %v398_v41 = vmul.f32 %v394_v35, %v228_v48  ;;  %v378_v63 = vadd.f32 %v374_v46, %v357_v43  ;;  %s633_s14 = sshll.u32 %s752_s5, 4  ;;  %s634_s14 = int_to_ptr.vmem [resolvable:$true] %s633_s14 }
 0x191   :  { %v379_v62 = vadd.f32 %v375_v20, %v358_v32  ;;  %v380_v40 = vadd.f32 %v376_v51, %v359_v33  ;;  %v381_v1 = vadd.f32 %v377_v39, %v360_v38  ;;  %v396_v47 = vmul.f32 %v392_v37, %v226_v16  ;;  %s716_s15 = scalar_lea.vmem %s634_s14, 1536  ;;  %p721_p6 = scmp.lt.s32.totalorder %s634_s14, %s634_s14 }
 0x192   :  { %v397_v2 = vmul.f32 %v391_v59, %v227_v58  ;;  %v399_v9 = vadd.f32 %v395_v53, %v378_v63  ;;  %v549_v28 = vunpack.c.l.bf16 %v836_v11  ;;  %v551_v44 = vunpack.c.l.bf16 %v841_v12  ;;  %p717_p5 = scmp.ne.s32.totalorder %s634_s14, %s716_s15  ;;  %p722_p7 = scmp.lt.s32.totalorder %s716_s15, %s716_s15 }
 0x193   :  { %v400_v10 = vadd.f32 %v396_v47, %v379_v62  ;;  %v402_v13 = vadd.f32 %v398_v41, %v381_v1  ;;  %v550_v60 = vunpack.c.l.bf16 %v818_v7  ;;  %v552_v45 = vunpack.c.l.bf16 %v823_v8 }
 0x194   :  { %v401_v54 = vadd.f32 %v397_v2, %v380_v40  ;;  %v553_v29 = vunpack.c.h.bf16 %v836_v11  ;;  %v555_v32 = vunpack.c.h.bf16 %v841_v12  ;;  %v554_v33 = vunpack.c.h.bf16 %v818_v7  ;;  %p723_p8 = por %p722_p7, %p721_p6 }
 0x195   :  { %v556_v49 = vunpack.c.h.bf16 %v823_v8  ;;  %v557_v46 = vunpack.c.l.bf16 %v811_v5  ;;  %v559_v20 = vunpack.c.l.bf16 %v813_v6  ;;  %v558_v6 = vunpack.c.l.bf16 %v807_v3 }
 0x196   :  { %v560_v63 = vunpack.c.l.bf16 %v809_v4  ;;  %p724_p9 = pnand %p723_p8, %p717_p5 }
 0x199   :  { %v579_v24 = vpop.permute.xlu0 %578 }
 0x19a   :  { %v407_v42 = vpop.permute.xlu1 %406 }
 0x19b   :  { %v409_v50 = vadd.f32 %v407_v42, %v399_v9  ;;  %v410_v57 = vadd.f32 %v407_v42, %v400_v10  ;;  %v411_v31 = vadd.f32 %v407_v42, %v401_v54  ;;  %v412_v14 = vadd.f32 %v407_v42, %v402_v13 }
 0x19d   :  { %v417_v15 = vpack.c.bf16 %v410_v57, %v410_v57  ;;  %v419_v55 = vpack.c.bf16 %v412_v14, %v412_v14  ;;  %v416_v18 = vpack.c.bf16 %v409_v50, %v409_v50  ;;  %v418_v61 = vpack.c.bf16 %v411_v31, %v411_v31  ;;  %v589_v1 = vpop.permute.xlu0 %588 }
 0x19e   :  { %v584_v37 = vpop.permute.xlu1 %583 }
 0x19f   :  { %662 = vmatprep.subr.msk.bf16.mxu0 %vm94_vm0, %v417_v15  ;;  %665 = vmatprep.subr.msk.bf16.mxu1 %vm94_vm0, %v419_v55  ;;  %v436_v36 = vsel %vm94_vm0, %v416_v18, 0  ;;  %v442_v19 = vsel %vm94_vm0, %v418_v61, 0 }
 0x1a0   :  { %462 = vmatpush1.bf16.msra.mxu0 %v436_v36  ;;  %513 = vmatpush1.bf16.msra.mxu1 %v442_v19 }
 0x1a3   :  { %663 = vmatmul.mubr.msk.bf16.vlgmr.msra.gmra.mxu0 %vm428_vm10, %v694_v21  ;;  %666 = vmatmul.mubr.msk.bf16.vlgmr.msra.gmra.mxu1 %vm428_vm10, %v694_v21 }
 0x1a4   :  { %489 = vmatprep.mubr.bf16.mxu0 %v743_v0  ;;  %540 = vmatprep.mubr.bf16.mxu1 %v743_v0 }
 0x1ab   :  { %664 = vmatmul.mubr.msk.bf16.gmra.mxu0 %vm428_vm10, %v695_v25  ;;  %667 = vmatmul.mubr.msk.bf16.gmra.mxu1 %vm428_vm10, %v695_v25 }
 0x263   :  { %v481_v56 = vpop.f32.mrf.mxu0  ;;  %v532_v17 = vpop.f32.mrf.mxu1 }
 0x264   :  { %v561_v26 = vadd.f32 %v549_v28, %v481_v56  ;;  %v563_v27 = vadd.f32 %v551_v44, %v532_v17 }
 0x265   :  { %v483_v0 = vpop.f32.mrf.mxu0  ;;  %v534_v22 = vpop.f32.mrf.mxu1 }
 0x266   :  { %v591_v34 = vadd.f32 %v579_v24, %v561_v26  ;;  %v593_v23 = vadd.f32 %v579_v24, %v563_v27  ;;  %v562_v30 = vadd.f32 %v550_v60, %v483_v0  ;;  %v564_v52 = vadd.f32 %v552_v45, %v534_v22 }
 0x267   :  { %v485_v48 = vpop.f32.mrf.mxu0  ;;  %v536_v35 = vpop.f32.mrf.mxu1 }
 0x268   :  { %v603_v51 = vmax.f32 %v591_v34, 0.0  ;;  %v605_v39 = vmax.f32 %v593_v23, 0.0  ;;  %v592_v43 = vadd.f32 %v579_v24, %v562_v30  ;;  %v594_v11 = vadd.f32 %v579_v24, %v564_v52 }
 0x269   :  { %v565_v38 = vadd.f32 %v553_v29, %v485_v48  ;;  %v567_v12 = vadd.f32 %v555_v32, %v536_v35  ;;  %v487_v16 = vpop.f32.mrf.mxu0  ;;  %v538_v7 = vpop.f32.mrf.mxu1 }
 0x26a   :  { %615 = vst [vmem:[#allocation5] sm:$0xff] %v603_v51  ;;  %622 = vst [vmem:[#allocation5 + $0x30] sm:$0xff] %v605_v39  ;;  %v604_v8 = vmax.f32 %v592_v43, 0.0  ;;  %v606_v58 = vmax.f32 %v594_v11, 0.0  ;;  %v566_v59 = vadd.f32 %v554_v33, %v487_v16  ;;  %v568_v62 = vadd.f32 %v556_v49, %v538_v7 }
 0x26b   :  { %v595_v40 = vadd.f32 %v584_v37, %v565_v38  ;;  %v597_v53 = vadd.f32 %v584_v37, %v567_v12  ;;  %v491_v5 = vpop.f32.mrf.mxu0  ;;  %v542_v41 = vpop.f32.mrf.mxu1 }
 0x26c   :  { %616 = vst [vmem:[#allocation5 + $0x8] sm:$0xff] %v604_v8  ;;  %623 = vst [vmem:[#allocation5 + $0x38] sm:$0xff] %v606_v58  ;;  %v596_v47 = vadd.f32 %v584_v37, %v566_v59  ;;  %v598_v2 = vadd.f32 %v584_v37, %v568_v62  ;;  %v569_v9 = vadd.f32 %v557_v46, %v491_v5 }
 0x26d   :  { %v571_v10 = vadd.f32 %v559_v20, %v542_v41  ;;  %v607_v54 = vmax.f32 %v595_v40, 0.0  ;;  %v609_v13 = vmax.f32 %v597_v53, 0.0  ;;  %v493_v42 = vpop.f32.mrf.mxu0  ;;  %v544_v50 = vpop.f32.mrf.mxu1 }
 0x26e   :  { %v608_v57 = vmax.f32 %v596_v47, 0.0  ;;  %v610_v31 = vmax.f32 %v598_v2, 0.0  ;;  %v599_v14 = vadd.f32 %v589_v1, %v569_v9  ;;  %v570_v3 = vadd.f32 %v558_v6, %v493_v42 }
 0x26f   :  { %v601_v15 = vadd.f32 %v589_v1, %v571_v10  ;;  %617 = vst [vmem:[#allocation5 + $0x10] sm:$0xff] %v607_v54  ;;  %624 = vst [vmem:[#allocation5 + $0x40] sm:$0xff] %v609_v13  ;;  %v572_v55 = vadd.f32 %v560_v63, %v544_v50  ;;  %v495_v4 = vpop.f32.mrf.mxu0  ;;  %v546_v18 = vpop.f32.mrf.mxu1 }
 0x270   :  { %618 = vst [vmem:[#allocation5 + $0x18] sm:$0xff] %v608_v57  ;;  %625 = vst [vmem:[#allocation5 + $0x48] sm:$0xff] %v610_v31  ;;  %v611_v61 = vmax.f32 %v599_v14, 0.0  ;;  %v600_v19 = vadd.f32 %v589_v1, %v570_v3 }
 0x271   :  { %v613_v36 = vmax.f32 %v601_v15, 0.0  ;;  %v602_v21 = vadd.f32 %v589_v1, %v572_v55  ;;  %v496_v25 = vpop.f32.mrf.mxu0  ;;  %v547_v28 = vpop.f32.mrf.mxu1 }
 0x272   :  { %619 = vst [vmem:[#allocation5 + $0x20] sm:$0xff] %v611_v61  ;;  %v612_v44 = vmax.f32 %v600_v19, 0.0 }
 0x273   :  { %626 = vst [vmem:[#allocation5 + $0x50] sm:$0xff] %v613_v36  ;;  %v614_v60 = vmax.f32 %v602_v21, 0.0 }
 0x274   :  { %620 = vst [vmem:[#allocation5 + $0x28] sm:$0xff] %v612_v44 }
 0x275   :  { %627 = vst [vmem:[#allocation5 + $0x58] sm:$0xff] %v614_v60 }
 0x276   :  { %727 = shalt.err (!%p724_p9)
}
 0x277   :  { %s753_s16 = smov 256  }
 0x278   :  { %639 = dma.vmem_to_hbm [thread:$0]  %s634_s14, 1536, %s1108_s7, [#allocation4], %s753_s16, %s753_s16, %s745_s1  }
 0x279   :  { %738 = dma.done.wait [#allocation4], 1536  }
 0x27a   :  { %739 = vsyncadd [#allocation4], 4294965760 }
 0x27b   :  { %643 = vsyncpa [#allocation3], 1 }
 0x27c   :  { %644 = vsyncpa [#allocation4], 1 }

</bundles_post_ra>
